<compile_context>
chip_gen: v7x
topology: tpu7x:2x2x1
jax: 0.10.0
libtpu: 0.0.40
codegen_flags: <defaults>
</compile_context>

<pallas_src>
import jax
import jax.numpy as jnp
from jax.experimental import pallas as pl
from jax.experimental.pallas import tpu as pltpu


def _ln_kernel(x_ref, w_ref, b_ref, o_ref):
    # x_ref: (1, C, TILE_HW) block — channels on sublanes, spatial on lanes.
    x = x_ref[...].astype(jnp.float32)
    mu = jnp.mean(x, axis=1, keepdims=True)                 # reduce over C (sublane axis)
    d = x - mu
    var = jnp.mean(d * d, axis=1, keepdims=True)            # population variance (unbiased=False)
    inv = jax.lax.rsqrt(var + 1e-5)
    w = w_ref[...].astype(jnp.float32)                      # (1, C, 1) — broadcasts over lanes
    b = b_ref[...].astype(jnp.float32)
    o_ref[...] = (d * inv * w + b).astype(o_ref.dtype)


def _pick_tile_hw(hw, c, dtype_bytes=4, max_tile_bytes=4 * 1024 * 1024):
    """Largest lane-dense tile (multiple of 128) dividing HW within a VMEM budget."""
    if hw % 128 != 0:
        # Full-extent block is always a legal block shape; small HW only.
        return hw
    best = 128
    t = 128
    while t <= hw:
        if hw % t == 0 and t * c * dtype_bytes <= max_tile_bytes:
            best = t
        t += 128
    return best


def ln_forward(x_nchw, weights, bias, *, tile_hw=None):
    """LayerNorm over channels of an NCHW tensor, per spatial location."""
    B, C, H, W = x_nchw.shape
    HW = H * W

    # b c h w -> b c (h w): pure reshape, no data movement.
    x = x_nchw.reshape(B, C, HW)
    w = weights.reshape(1, C, 1)
    b = bias.reshape(1, C, 1)

    if tile_hw is None:
        tile_hw = _pick_tile_hw(HW, C, dtype_bytes=jnp.dtype(x.dtype).itemsize
                                if jnp.dtype(x.dtype).itemsize >= 4 else 4)
    n_hw = HW // tile_hw

    out = pl.pallas_call(
        _ln_kernel,
        out_shape=jax.ShapeDtypeStruct((B, C, HW), x.dtype),
        grid_spec=pltpu.PrefetchScalarGridSpec(
            num_scalar_prefetch=0,
            grid=(B, n_hw),
            in_specs=[
                pl.BlockSpec((1, C, tile_hw), lambda i, j: (i, 0, j)),
                pl.BlockSpec((1, C, 1), lambda i, j: (0, 0, 0)),
                pl.BlockSpec((1, C, 1), lambda i, j: (0, 0, 0)),
            ],
            out_specs=pl.BlockSpec((1, C, tile_hw), lambda i, j: (i, 0, j)),
        ),
        compiler_params=pltpu.CompilerParams(
            dimension_semantics=("parallel", "parallel"),
            vmem_limit_bytes=64 * 1024 * 1024,
        ),
    )(x, w, b)

    # b c (h w) -> b c h w: pure reshape, no data movement.
    return out.reshape(B, C, H, W)


def _reference(x_nchw, weights, bias):
    B, C, H, W = x_nchw.shape
    x = x_nchw.reshape(B, C, H * W).astype(jnp.float32)
    mu = jnp.mean(x, axis=1, keepdims=True)
    var = jnp.mean((x - mu) ** 2, axis=1, keepdims=True)
    y = (x - mu) / jnp.sqrt(var + 1e-5) * weights.reshape(1, C, 1) + bias.reshape(1, C, 1)
    return y.reshape(B, C, H, W).astype(x_nchw.dtype)


if __name__ == "__main__":
    key = jax.random.PRNGKey(0)
    B, C, H, W = 2, 4, 16, 16

    x = jax.random.normal(key, (B, C, H, W), dtype=jnp.float32)
    # nn.Parameter(torch.ones(dim)) for both weights and bias.
    weights = jnp.ones((C,), dtype=jnp.float32)
    bias = jnp.ones((C,), dtype=jnp.float32)

    out = ln_forward(x, weights, bias)
    out = jax.block_until_ready(out)

    ref = _reference(x, weights, bias)
    assert out.shape == (B, C, H, W)
    assert jnp.allclose(out, ref, atol=1e-5, rtol=1e-5)

    print("KERNEL_OK")
</pallas_src>

<mosaic_0001>
module attributes {stable_mosaic.version = 11 : i64} {
  func.func @_ln_kernel(%arg0: i32, %arg1: i32, %arg2: memref<1x4x256xf32, #tpu.memory_space<vmem>>, %arg3: memref<1x4x1xf32, #tpu.memory_space<vmem>>, %arg4: memref<1x4x1xf32, #tpu.memory_space<vmem>>, %arg5: memref<1x4x256xf32, #tpu.memory_space<vmem>>) attributes {dimension_semantics = [#tpu.dimension_semantics<parallel>, #tpu.dimension_semantics<parallel>], iteration_bounds = array<i64: 2, 1>, scalar_prefetch = 0 : i64, scratch_operands = 0 : i64, tpu.core_type = #tpu.core_type<tc>, window_params = [{transform_indices = @transform_0, window_bounds = array<i64: 1, 4, 256>}, {pipeline_mode = #tpu.pipeline_mode<synchronous>, transform_indices = @transform_1, window_bounds = array<i64: 1, 4, 1>}, {pipeline_mode = #tpu.pipeline_mode<synchronous>, transform_indices = @transform_2, window_bounds = array<i64: 1, 4, 1>}, {transform_indices = @transform_3, window_bounds = array<i64: 1, 4, 256>}]} {
    %c0 = arith.constant 0 : index
    %c0_0 = arith.constant 0 : index
    %c0_1 = arith.constant 0 : index
    %0 = vector.load %arg2[%c0, %c0_0, %c0_1] : memref<1x4x256xf32, #tpu.memory_space<vmem>>, vector<1x4x256xf32>
    %cst = arith.constant dense<0.000000e+00> : vector<1x256xf32>
    %1 = vector.multi_reduction <add>, %0, %cst [1] : vector<1x4x256xf32> to vector<1x256xf32>
    %2 = vector.shape_cast %1 : vector<1x256xf32> to vector<1x1x256xf32>
    %cst_2 = arith.constant 4.000000e+00 : f32
    %3 = vector.broadcast %cst_2 : f32 to vector<1x1x256xf32>
    %4 = arith.divf %2, %3 : vector<1x1x256xf32>
    %5 = vector.broadcast %4 : vector<1x1x256xf32> to vector<1x4x256xf32>
    %6 = arith.subf %0, %5 : vector<1x4x256xf32>
    %7 = arith.mulf %6, %6 : vector<1x4x256xf32>
    %cst_3 = arith.constant dense<0.000000e+00> : vector<1x256xf32>
    %8 = vector.multi_reduction <add>, %7, %cst_3 [1] : vector<1x4x256xf32> to vector<1x256xf32>
    %9 = vector.shape_cast %8 : vector<1x256xf32> to vector<1x1x256xf32>
    %cst_4 = arith.constant 4.000000e+00 : f32
    %10 = vector.broadcast %cst_4 : f32 to vector<1x1x256xf32>
    %11 = arith.divf %9, %10 : vector<1x1x256xf32>
    %cst_5 = arith.constant 9.99999974E-6 : f32
    %12 = vector.broadcast %cst_5 : f32 to vector<1x1x256xf32>
    %13 = arith.addf %11, %12 : vector<1x1x256xf32>
    %14 = math.rsqrt %13 : vector<1x1x256xf32>
    %c0_6 = arith.constant 0 : index
    %c0_7 = arith.constant 0 : index
    %c0_8 = arith.constant 0 : index
    %15 = vector.load %arg3[%c0_6, %c0_7, %c0_8] : memref<1x4x1xf32, #tpu.memory_space<vmem>>, vector<1x4x1xf32>
    %c0_9 = arith.constant 0 : index
    %c0_10 = arith.constant 0 : index
    %c0_11 = arith.constant 0 : index
    %16 = vector.load %arg4[%c0_9, %c0_10, %c0_11] : memref<1x4x1xf32, #tpu.memory_space<vmem>>, vector<1x4x1xf32>
    %17 = vector.broadcast %14 : vector<1x1x256xf32> to vector<1x4x256xf32>
    %18 = arith.mulf %6, %17 : vector<1x4x256xf32>
    %19 = vector.broadcast %15 : vector<1x4x1xf32> to vector<1x4x256xf32>
    %20 = arith.mulf %18, %19 : vector<1x4x256xf32>
    %21 = vector.broadcast %16 : vector<1x4x1xf32> to vector<1x4x256xf32>
    %22 = arith.addf %20, %21 : vector<1x4x256xf32>
    %c0_12 = arith.constant 0 : index
    %c0_13 = arith.constant 0 : index
    %c0_14 = arith.constant 0 : index
    %23 = vector.load %arg5[%c0_12, %c0_13, %c0_14] : memref<1x4x256xf32, #tpu.memory_space<vmem>>, vector<1x4x256xf32>
    tpu.vector_store %arg5[%c0_12, %c0_13, %c0_14], %22 {strides = array<i32>} : memref<1x4x256xf32, #tpu.memory_space<vmem>>, vector<1x4x256xf32>,
    return
  }
  func.func @transform_0(%arg0: i32, %arg1: i32) -> (i32, i32, i32) {
    %c0_i32 = arith.constant 0 : i32
    %c0_i32_0 = arith.constant 0 : i32
    return %arg0, %c0_i32, %arg1 : i32, i32, i32
  }
  func.func @transform_1(%arg0: i32, %arg1: i32) -> (i32, i32, i32) {
    %c0_i32 = arith.constant 0 : i32
    %c0_i32_0 = arith.constant 0 : i32
    %c0_i32_1 = arith.constant 0 : i32
    %c0_i32_2 = arith.constant 0 : i32
    return %c0_i32, %c0_i32_0, %c0_i32_1 : i32, i32, i32
  }
  func.func @transform_2(%arg0: i32, %arg1: i32) -> (i32, i32, i32) {
    %c0_i32 = arith.constant 0 : i32
    %c0_i32_0 = arith.constant 0 : i32
    %c0_i32_1 = arith.constant 0 : i32
    %c0_i32_2 = arith.constant 0 : i32
    return %c0_i32, %c0_i32_0, %c0_i32_1 : i32, i32, i32
  }
  func.func @transform_3(%arg0: i32, %arg1: i32) -> (i32, i32, i32) {
    %c0_i32 = arith.constant 0 : i32
    %c0_i32_0 = arith.constant 0 : i32
    return %arg0, %c0_i32, %arg1 : i32, i32, i32
  }
}

</mosaic_0001>

<bundles_post_ra>
// kernel: tpu_custom_call.1
= control target key start
LH: loop header
LB: loop body
LE: loop exit
PB: predicated region body
PF: predicated region fallthrough
CT: control target
= control target key end

     0   :  { %8 = vsyncpa [#allocation3], 0  ;;  %s1000_s0 = inlined_call_operand.hbm [shape: f32[2,4,256], index: 0, kind: input, shape index: {}]   ;;  %s1001_s1 = inlined_call_operand.hbm [shape: f32[1,4,1], index: 1, kind: input, shape index: {}]   ;;  %s1002_s2 = inlined_call_operand.hbm [shape: f32[1,4,1], index: 2, kind: input, shape index: {}]   ;;  %s1003_s3 = inlined_call_operand.hbm [shape: f32[2,4,256], index: 3, kind: output, shape index: {}]  }
   0x1   :  { %10 = vsyncpa [#allocation3 + $0x1], 0 }
   0x2   :  { %11 = vsyncpa [#allocation6], 0 }
   0x3   :  { %12 = vsyncpa [#allocation4], 0 }
   0x4   :  { %14 = vsyncpa [#allocation4 + $0x1], 0  ;;  %s749_s12 = smov 0   ;;  %s751_s13 = smov 0  }
   0x5   :  { %s753_s14 = smov 0   ;;  %s755_s15 = smov 0  }
   0x6   :  { %s757_s16 = smov 0   ;;  %s759_s17 = smov 0  }
   0x7 LB: > { %s437_s18 = sadd.s32 4294967295, %s721_s17   ;;  %s438_s19 = sadd.s32 4294967294, %s721_s17   ;;  %s721_s17 = sphi %s759_s17, %s20_s17   ;;  %s717_s16 = sphi %s757_s16, %s1026_s16   ;;  %s713_s15 = sphi %s755_s15, %s1025_s15   ;;  %s709_s14 = sphi %s753_s14, %s1024_s14   ;;  %s705_s13 = sphi %s751_s13, %s1023_s13   ;;  %s701_s12 = sphi %s749_s12, %s1022_s12  }
   0x8   : > { %p54_p0 = scmp.ne.s32.totalorder %s705_s13, %s701_s12  ;;  %p783_p1 = scmp.eq.s32.totalorder %s437_s18, 0 }
   0x9   : > { %p787_p2 = scmp.eq.s32.totalorder %s437_s18, 1  ;;  %p128_p3 = scmp.eq.s32.totalorder %s438_s19, 1 }
   0xa   : > { %s1008_s20 = scalar_select %p783_p1, 1, 0 }
   0xb   : > { %s1009_s21 = scalar_select %p787_p2, 1, 0 }
   0xc   : > { %p793_p4 = por %p783_p1, %p54_p0  ;;  %p439_p5 = scmp.ge.s32.totalorder %s721_s17, 1 }
   0xd   : > { %p798_p6 = por %p128_p3, %p54_p0  ;;  %p135_p7 = scmp.lt.s32.totalorder %s721_s17, 3 }
   0xe   : > { %s1010_s22 = scalar_select %p793_p4, 1, 0 }
   0xf   : > { %s1011_s23 = scalar_select %p798_p6, 1, 0 }
  0x10   : > { %p803_p8 = pnand %p439_p5, %p135_p7  ;;  %s723_s25 = smov [#allocation5]  }
  0x11   : > { %s148_s26 = sshll.u32 %s723_s25, 4  ;;  %s724_s27 = smov [#allocation7]   ;;  %s149_s26 = int_to_ptr.vmem [resolvable:$true] %s148_s26 }
  0x12   : > { %s1012_s24 = scalar_select %p803_p8, 1, 0 }
  0x13   : > { %p470_p10 = pneg %p803_p8  ;;  %s159_s28 = sshll.u32 %s724_s27, 4  ;;  %s816_s28 = int_to_ptr.vmem [resolvable:$true] %s159_s28 }
  0x14   : > { %s549_s5 = scalar_lea.hbm %s1001_s1, 64 }
  0x15   : > { %p812_p11 = pnand %p470_p10, %p783_p1  ;;  %p550_p12 = scmp.ne.s32.totalorder %s1001_s1, %s549_s5 }
  0x16   : > { %p556_p5 = scmp.lt.u32.totalorder %s549_s5, %s1001_s1 }
  0x17   : > { %p551_p13 = pneg %p812_p11 }
  0x19   : > { %p552_p0 = pnand %p551_p13, %p550_p12 }
  0x1b   : > { %p553_p3 = pneg %p552_p0 }
  0x1d   : > { %p558_p7 = pnand %p556_p5, %p553_p3 }
  0x1f   : > { %561 = shalt.err (!%p558_p7)
}
  0x20   : > { %s562_s10 = scalar_lea.vmem %s149_s26, 64  ;;  %p570_p1 = scmp.lt.s32.totalorder %s149_s26, %s149_s26 }
  0x21   : > { %p563_p10 = scmp.ne.s32.totalorder %s149_s26, %s562_s10  ;;  %p571_p4 = scmp.lt.s32.totalorder %s562_s10, %s562_s10 }
  0x23   : > { %p565_p9 = pnand %p563_p10, %p551_p13  ;;  %p572_p8 = por %p571_p4, %p570_p1 }
  0x25   : > { %p566_p6 = pneg %p565_p9 }
  0x27   : > { %p573_p2 = pnand %p572_p8, %p566_p6 }
  0x29   : > { %576 = shalt.err (!%p573_p2)
}
  0x2a   : > { %473 = dma.hbm_to_vmem [thread:$0]  (!%p812_p11), %s1001_s1, 64, %s149_s26, [#allocation6]  }
  0x2b   : > { %s577_s27 = scalar_lea.hbm %s1002_s2, 64 }
  0x2c   : > { %p578_p9 = scmp.ne.s32.totalorder %s1002_s2, %s577_s27  ;;  %p584_p2 = scmp.lt.u32.totalorder %s577_s27, %s1002_s2 }
  0x2e   : > { %p580_p1 = pnand %p578_p9, %p551_p13 }
  0x30   : > { %p581_p4 = pneg %p580_p1 }
  0x32   : > { %p586_p6 = pnand %p584_p2, %p581_p4 }
  0x34   : > { %589 = shalt.err (!%p586_p6)
}
  0x35   : > { %s590_s26 = scalar_lea.vmem %s816_s28, 64  ;;  %p598_p3 = scmp.lt.s32.totalorder %s816_s28, %s816_s28 }
  0x36   : > { %p591_p8 = scmp.ne.s32.totalorder %s816_s28, %s590_s26  ;;  %p599_p5 = scmp.lt.s32.totalorder %s590_s26, %s590_s26 }
  0x38   : > { %p593_p12 = pnand %p591_p8, %p551_p13  ;;  %p600_p7 = por %p599_p5, %p598_p3 }
  0x3a   : > { %p594_p0 = pneg %p593_p12 }
  0x3c   : > { %p601_p10 = pnand %p600_p7, %p594_p0 }
  0x3e   : > { %604 = shalt.err (!%p601_p10)
}
  0x3f   : > { %476 = dma.hbm_to_vmem [thread:$0]  (!%p812_p11), %s1002_s2, 64, %s816_s28, [#allocation6]  }
  0x40   : > { %s32_s9 = sadd.s32 1, %s717_s16  ;;  %s41_s10 = sadd.s32 1, %s709_s14 }
  0x41   : > { %p34_p13 = scmp.ge.s32.totalorder %s32_s9, 2  ;;  %p48_p9 = scmp.ne.s32.totalorder %s709_s14, %s705_s13 }
  0x42   : > { %p49_p1 = scmp.eq.s32.totalorder %s721_s17, 0  ;;  %p487_p4 = scmp.lt.s32.totalorder %s721_s17, 2 }
  0x43   : > { %s1028_s9 = smov (%p34_p13, %s32_s9), 0  ;;  %p1014_p6 = scmp.ne.s32.totalorder %s1009_s21, 0 }
  0x44   : > { %p50_p2 = por %p49_p1, %p48_p9  ;;  %s36_s11 = ssub.s32 %s717_s16, %s1028_s9 }
  0x45   : > { %p875_p8 = por %p1014_p6, %p48_p9  ;;  %s170_s18 = sand.u32 1, %s709_s14  }
  0x46   : > { %p39_p12 = scmp.eq.s32.totalorder %s36_s11, 0  ;;  %s443_s28 = sshll.u32 %s170_s18, 3 }
  0x47   : > { %s456_s19 = sshll.u32 %s717_s16, 7  ;;  %s174_s21 = scalar_lea.vmem [#allocation2], %s443_s28 }
  0x48   : > { %s884_s25 = scalar_select %p39_p12, %s709_s14, %s41_s10  }
  0x49   : > { %s889_s4 = scalar_lea.hbm %s1000_s0, %s456_s19  ;;  %s184_s5 = sshll.u32 %s174_s21, 4  ;;  %s897_s5 = int_to_ptr.vmem [resolvable:$true] %s184_s5 }
  0x4a   : > { %p893_p11 = pnand %p487_p4, %p50_p2  ;;  %s171_s26 = scalar_lea.sflag [#allocation3], %s170_s18 }
  0x4b   : > { %s605_s7 = scalar_lea.hbm %s889_s4, 128  ;;  %s610_s11 = scalar_lea.hbm %s1000_s0, 256 }
  0x4c   : > { %p606_p0 = scmp.ne.s32.totalorder %s889_s4, %s605_s7  ;;  %p607_p3 = pneg %p893_p11 }
  0x4d   : > { %p611_p10 = scmp.lt.u32.totalorder %s889_s4, %s1000_s0  ;;  %p612_p13 = scmp.lt.u32.totalorder %s610_s11, %s605_s7 }
  0x4e   : > { %p608_p5 = pnand %p607_p3, %p606_p0  ;;  %p614_p1 = scmp.lt.u32.totalorder %s605_s7, %s889_s4 }
  0x4f   : > { %p613_p9 = por %p612_p13, %p611_p10 }
  0x50   : > { %p609_p7 = pneg %p608_p5 }
  0x51   : > { %p615_p4 = por %p614_p1, %p613_p9 }
  0x53   : > { %p616_p2 = pnand %p615_p4, %p609_p7 }
  0x55   : > { %619 = shalt.err (!%p616_p2)
}
  0x56   : > { %s620_s18 = scalar_lea.vmem %s897_s5, 128  ;;  %s725_s27 = smov [#allocation2]  }
  0x57   : > { %p621_p6 = scmp.ne.s32.totalorder %s897_s5, %s620_s18  ;;  %s625_s30 = sshll.u32 %s725_s27, 4  ;;  %s626_s30 = int_to_ptr.vmem [resolvable:$false] %s625_s30 }
  0x58   : > { %s627_s21 = scalar_lea.vmem %s626_s30, 256  ;;  %p628_p5 = scmp.lt.s32.totalorder %s897_s5, %s626_s30 }
  0x59   : > { %p623_p12 = pnand %p621_p6, %p607_p3  ;;  %p629_p10 = scmp.lt.s32.totalorder %s627_s21, %s620_s18 }
  0x5b   : > { %p624_p0 = pneg %p623_p12  ;;  %p630_p13 = por %p629_p10, %p628_p5 }
  0x5d   : > { %p631_p9 = pnand %p630_p13, %p624_p0 }
  0x5f   : > { %634 = shalt.err (!%p631_p9)
}
  0x60   : > { %480 = dma.hbm_to_vmem [thread:$0]  (!%p893_p11), %s889_s4, 128, %s897_s5, %s171_s26  }
  0x61   : > { %p1017_p7 = scmp.ne.s32.totalorder %s1012_s24, 0 }
  0x62   : > { %s927_s7 = sand.u32 (!%p1017_p7), 1, %s705_s13   ;;  %p1018_p3 = scmp.ne.s32.totalorder (!%p1017_p7), %s1010_s22, 0 }
  0x63   : > { %193 = sbr.rel (%p1017_p7) target bundleno = 262 (0x106), region = 32  ;;  %s447_s8 = sshll.u32 (!%p1017_p7), %s927_s7, 3 }
  0x64   : > { %s196_s10 = scalar_lea.sflag (!%p1017_p7), [#allocation3], %s927_s7  ;;  %s199_s11 = scalar_lea.vmem (!%p1017_p7), [#allocation2], %s447_s8 }
  0x6a   : > { %688 = dma.done.wait (%p1018_p3), %s196_s10, 128  }
  0x6b   : > { %690 = vsyncadd (%p1018_p3), %s196_s10, 4294967168  ;;  %p1019_p11 = scmp.ne.s32.totalorder %s1008_s20, 0 }
  0x6d   : > { %692 = dma.done.wait (%p1019_p11), [#allocation6], 128  }
  0x6e   : > { %694 = vsyncadd (%p1019_p11), [#allocation6], 4294967168  ;;  %v726_v0 = vmov 0   ;;  %v283_v1 = vld [vmem:[#allocation5] sm:$0xf]  ;;  %v232_v3 = vld [vmem:[%s199_s11] sm:$0xff]  ;;  %v297_v45 = vlaneseq }
  0x6f   : > { %543 = vset.pattern.permute.xlu0 %v726_v0  ;;  %v284_v2 = vld [vmem:[#allocation7] sm:$0xf]  ;;  %v234_v4 = vcombine.high %v232_v3, %v232_v3  ;;  %vm236_vm0 = vcmask 1043456   ;;  %v727_v43 = vmov 839922192   ;;  %s457_s20 = sshll.u32 %s713_s15, 7 }
  0x70   : > { %292 = vperm.xlu0 %543, %v283_v1   ;;  %v237_v5 = vsel %vm236_vm0, %v232_v3, 0.0  ;;  %v295_v44 = vunpack.c.l.s4 %v727_v43  ;;  %v298_v48 = vshrl.u32 %v297_v45, 7  ;;  %s229_s22 = scalar_lea.vmem [#allocation8], %s447_s8  ;;  %s951_s6 = scalar_lea.hbm %s1003_s3, %s457_s20 }
  0x71   : > { %v244_v6 = vsel %vm236_vm0, %v234_v4, 0.0  ;;  %v238_v7 = vrot.slane %v237_v5, 4  ;;  %s334_s24 = sshll.u32 %s229_s22, 4  ;;  %s318_s26 = scalar_lea.sflag [#allocation4], %s927_s7  ;;  %s953_s24 = int_to_ptr.vmem [resolvable:$true] %s334_s24 }
  0x72   : > { %v245_v8 = vrot.slane %v244_v6, 4  ;;  %v296_v47 = vunpack.c.0.s8 %v295_v44  ;;  %s635_s28 = scalar_lea.vmem %s953_s24, 128  ;;  %s728_s15 = smov [#allocation8]  }
  0x73   : > { %v239_v9 = vadd.f32 %v238_v7, %v237_v5  ;;  %p636_p1 = scmp.ne.s32.totalorder %s953_s24, %s635_s28  ;;  %s639_s19 = sshll.u32 %s728_s15, 4  ;;  %s640_s19 = int_to_ptr.vmem [resolvable:$false] %s639_s19 }
  0x74   : > { %305 = vperm.xlu0 %543, %v284_v2   ;;  %v246_v10 = vadd.f32 %v245_v8, %v244_v6  ;;  %v299_v50 = vsub.s32 %v296_v47, %v298_v48  ;;  %s641_s18 = scalar_lea.vmem %s640_s19, 256  ;;  %p642_p6 = scmp.lt.s32.totalorder %s953_s24, %s640_s19 }
  0x75   : > { %v240_v11 = vrot.slane %v239_v9, 2  ;;  %p637_p4 = pnand %p636_p1, %p875_p8  ;;  %p643_p12 = scmp.lt.s32.totalorder %s641_s18, %s635_s28 }
  0x76   : > { %v247_v12 = vrot.slane %v246_v10, 2 }
  0x77   : > { %v241_v13 = vadd.f32 %v240_v11, %v239_v9  ;;  %p638_p2 = pneg %p637_p4  ;;  %p644_p0 = por %p643_p12, %p642_p6 }
  0x78   : > { %v248_v14 = vadd.f32 %v247_v12, %v246_v10 }
  0x79   : > { %v242_v15 = vrot.slane %v241_v13, 1  ;;  %p645_p5 = pnand %p644_p0, %p638_p2 }
  0x7a   : > { %v249_v16 = vrot.slane %v248_v14, 1 }
  0x7b   : > { %v243_v17 = vadd.f32 %v242_v15, %v241_v13 }
  0x7c   : > { %v250_v18 = vadd.f32 %v249_v16, %v248_v14 }
  0x7d   : > { %v252_v19 = vmul.f32 0.25, %v243_v17 }
  0x7e   : > { %v253_v20 = vmul.f32 0.25, %v250_v18 }
  0x80   : > { %v256_v21 = vcombine.low %v252_v19, %v253_v20 }
  0x82   : > { %v258_v22 = vsub.f32 %v232_v3, %v256_v21 }
  0x84   : > { %v259_v23 = vmul.f32 %v258_v22, %v258_v22 }
  0x86   : > { %v261_v24 = vcombine.high %v259_v23, %v259_v23  ;;  %v263_v25 = vsel %vm236_vm0, %v259_v23, 0.0 }
  0x87   : > { %v264_v27 = vrot.slane %v263_v25, 4 }
  0x88   : > { %v270_v26 = vsel %vm236_vm0, %v261_v24, 0.0 }
  0x89   : > { %v271_v28 = vrot.slane %v270_v26, 4  ;;  %v265_v29 = vadd.f32 %v264_v27, %v263_v25 }
  0x8b   : > { %v272_v30 = vadd.f32 %v271_v28, %v270_v26  ;;  %v266_v31 = vrot.slane %v265_v29, 2 }
  0x8d   : > { %v273_v32 = vrot.slane %v272_v30, 2  ;;  %v267_v33 = vadd.f32 %v266_v31, %v265_v29 }
  0x8f   : > { %v274_v34 = vadd.f32 %v273_v32, %v272_v30  ;;  %v268_v35 = vrot.slane %v267_v33, 1 }
  0x91   : > { %v275_v36 = vrot.slane %v274_v34, 1  ;;  %v269_v37 = vadd.f32 %v268_v35, %v267_v33 }
  0x93   : > { %v276_v38 = vadd.f32 %v275_v36, %v274_v34  ;;  %v277_v39 = vmul.f32 0.25, %v269_v37 }
  0x95   : > { %v278_v40 = vmul.f32 0.25, %v276_v38  ;;  %v279_v41 = vadd.f32 1e-05, %v277_v39 }
  0x97   : > { %v280_v42 = vadd.f32 1e-05, %v278_v40  ;;  %545 = vrsqrt.f32 %v279_v41 }
  0x99   : > { %547 = vrsqrt.f32 %v280_v42 }
  0xa1   : > { %v546_v46 = vpop.eup %545 }
  0xa3   : > { %v548_v49 = vpop.eup %547 }
  0xa4   : > { %v287_v51 = vcombine.low %v546_v46, %v548_v49 }
  0xa6   : > { %v289_v53 = vmul.f32 %v287_v51, %v258_v22 }
  0xef   : > { %v293_v52 = vpop.permute.xlu0 %292 }
  0xf0   : > { %v300_v54 = vrot.slane %v293_v52, %v299_v50 }
  0xf2   : > { %v302_v56 = vmul.f32 %v300_v54, %v289_v53 }
  0xf3   : > { %v306_v55 = vpop.permute.xlu0 %305 }
  0xf4   : > { %v313_v57 = vrot.slane %v306_v55, %v299_v50 }
  0xf6   : > { %v315_v58 = vadd.f32 %v313_v57, %v302_v56 }
  0xf8   : > { %316 = vst [vmem:[%s229_s22] sm:$0xff] %v315_v58 }
  0xf9   : > { %648 = shalt.err (!%p645_p5)
}
  0xfa   : > { %s649_s27 = scalar_lea.hbm %s951_s6, 128  ;;  %s653_s7 = scalar_lea.hbm %s1003_s3, 256 }
  0xfb   : > { %p650_p10 = scmp.ne.s32.totalorder %s951_s6, %s649_s27  ;;  %p654_p7 = scmp.lt.u32.totalorder %s951_s6, %s1003_s3 }
  0xfc   : > { %p655_p3 = scmp.lt.u32.totalorder %s653_s7, %s649_s27  ;;  %p657_p1 = scmp.lt.u32.totalorder %s649_s27, %s951_s6 }
  0xfd   : > { %p651_p13 = pnand %p650_p10, %p875_p8 }
  0xfe   : > { %p656_p11 = por %p655_p3, %p654_p7 }
  0xff   : > { %p652_p9 = pneg %p651_p13 }
 0x100   : > { %p658_p4 = por %p657_p1, %p656_p11 }
 0x102   : > { %p659_p2 = pnand %p658_p4, %p652_p9 }
 0x104   : > { %662 = shalt.err (!%p659_p2)
}
 0x105   : > { %468 = dma.vmem_to_hbm [thread:$0]  (%p875_p8), %s953_s24, 128, %s951_s6, %s318_s26  }
 0x106 PF: > { %s346_s11 = sand.u32 1, %s701_s12   ;;  %p1020_p6 = scmp.ne.s32.totalorder %s1011_s23, 0 }
 0x107   : > { %p1021_p12 = scmp.ge.s32.totalorder %s721_s17, 2  ;;  %s347_s20 = scalar_lea.sflag [#allocation4], %s346_s11 }
 0x109   : > { %p482_p0 = pnand %p1021_p12, %p1020_p6 }
 0x10b   : > { %696 = dma.done.wait (!%p482_p0), %s347_s20, 128  }
 0x10c   : > { %698 = vsyncadd (!%p482_p0), %s347_s20, 4294967168  ;;  %s20_s17 = sadd.s32 1, %s721_s17   ;;  %s1022_s12 = smov %s705_s13 }
 0x10d   : > { %p17_p5 = scmp.ge.s32.totalorder %s20_s17, 4   ;;  %s1023_s13 = smov %s709_s14 }
 0x10e   : > { %s1024_s14 = smov %s884_s25  ;;  %s1025_s15 = smov %s717_s16 }
 0x10f   : > { %s1026_s16 = smov %s1028_s9  ;;  %19 = sbr.rel (!%p17_p5) target bundleno = 7 (0x7), region = 85 }
 0x116   :  { %352 = vsyncpa [#allocation3], 1 }
 0x117   :  { %354 = vsyncpa [#allocation3 + $0x1], 1 }
 0x118   :  { %355 = vsyncpa [#allocation6], 1 }
 0x119   :  { %356 = vsyncpa [#allocation4], 1 }
 0x11a   :  { %358 = vsyncpa [#allocation4 + $0x1], 1 }

</bundles_post_ra>
